<compile_context>
chip_gen: v5e
topology: v5e:2x2
jax: 0.10.0
libtpu: 0.0.40
codegen_flags: <defaults>
</compile_context>

<pallas_src>
import functools

import jax
import jax.numpy as jnp
from jax.experimental import pallas as pl
from jax.experimental.pallas import tpu as pltpu


def _round_up(v: int, m: int) -> int:
    return ((v + m - 1) // m) * m


def mlp_kernel(x_ref, w1_ref, b1_ref, w2_ref, b2_ref, w3_ref, b3_ref, o_ref):
    """Fused hot path: (matmul -> bias -> ReLU) x2 -> matmul -> bias, in VMEM.

    Matmuls accumulate in f32 (preferred_element_type); bias add and ReLU stay
    in f32.  The matmul-input dtype (f32 or bf16) is decided in the wrapper.
    """
    x = x_ref[...]
    cdt = x.dtype  # compute (matmul-input) dtype: f32 or bf16

    h1 = jnp.dot(x, w1_ref[...], preferred_element_type=jnp.float32) + b1_ref[...]
    h1 = jnp.maximum(h1, 0.0).astype(cdt)

    h2 = jnp.dot(h1, w2_ref[...], preferred_element_type=jnp.float32) + b2_ref[...]
    h2 = jnp.maximum(h2, 0.0).astype(cdt)

    out = jnp.dot(h2, w3_ref[...], preferred_element_type=jnp.float32) + b3_ref[...]
    o_ref[...] = out.astype(o_ref.dtype)


def prepare_params(w1, b1, w2, b2, w3, b3, *, use_bf16=False):
    """One-time parameter prep (call at setup, NOT per forward call).

    Pads the hidden dim of the weights/biases to a multiple of 128 (zero
    padding is exact: padded activation columns are 0 through bias+ReLU and
    hit zero weight rows in the next matmul) and optionally casts the weights
    to bf16.  Biases stay f32 so the in-kernel bias/ReLU path is f32.
    The narrow num_i / num_o dims are deliberately left unpadded.
    """
    num_i, num_h = w1.shape
    num_o = w3.shape[1]
    num_h_p = _round_up(num_h, 128)
    dh = num_h_p - num_h
    wdt = jnp.bfloat16 if use_bf16 else w1.dtype

    w1p = jnp.pad(w1, ((0, 0), (0, dh))).astype(wdt)                    # (num_i, H)
    w2p = jnp.pad(w2, ((0, dh), (0, dh))).astype(wdt)                   # (H, H)
    w3p = jnp.pad(w3, ((0, dh), (0, 0))).astype(wdt)                    # (H, num_o)
    b1p = jnp.pad(jnp.reshape(b1, (1, -1)), ((0, 0), (0, dh))).astype(jnp.float32)
    b2p = jnp.pad(jnp.reshape(b2, (1, -1)), ((0, 0), (0, dh))).astype(jnp.float32)
    b3p = jnp.reshape(b3, (1, -1)).astype(jnp.float32)
    return w1p, b1p, w2p, b2p, w3p, b3p


@functools.partial(jax.jit, static_argnames=("block_b", "use_bf16"))
def mlp_forward(x, w1, b1, w2, b2, w3, b3, *, block_b=1024, use_bf16=False):
    """x: (B, num_i); params as returned by prepare_params(). Returns (B, num_o)."""
    B, num_i = x.shape
    num_h_p = w1.shape[1]   # padded hidden dim (multiple of 128)
    num_o = w3.shape[1]     # unpadded
    out_dtype = x.dtype

    # Batch tile: sublane-aligned (8 rows f32 / 16 rows bf16), capped at
    # block_b, and clamped so the grid has >= 2 steps (v7x has 2 TensorCores
    # sharded via dimension_semantics=("parallel",)).  Partial tail block is
    # clipped by Pallas -- no batch padding is materialized.
    row_align = 16 if use_bf16 else 8
    half = _round_up(pl.cdiv(B, 2), row_align)
    bb = min(_round_up(block_b, row_align), half)
    grid = (pl.cdiv(B, bb),)

    if use_bf16:
        x = x.astype(jnp.bfloat16)  # boundary cast: halves the dominant x DMA

    in_isz = 2 if use_bf16 else 4
    out_isz = jnp.dtype(out_dtype).itemsize
    # Resident-footprint estimate: double-buffered x/out tiles, weights/biases
    # (conservatively 2x), f32 intermediates.  Capped below physical VMEM on
    # v7x (64 MiB) with headroom for compiler-internal scratch.
    vmem_est = (
        2 * bb * num_i * in_isz
        + 2 * bb * num_o * out_isz
        + 2 * (num_i * num_h_p + num_h_p * num_h_p + num_h_p * num_o) * in_isz
        + 2 * 3 * 8 * num_h_p * 4
        + 4 * bb * num_h_p * 4
    )
    vmem_limit = int(min(max(2 * vmem_est + (4 << 20), 32 << 20),
                         int(0.85 * (64 << 20))))

    # Grid-invariant specs (index_map -> (0, 0)) for weights/biases: fetched
    # into VMEM once, reused across all batch tiles.
    inv = lambda shape: pl.BlockSpec(shape, lambda i: (0, 0))

    out = pl.pallas_call(
        mlp_kernel,
        out_shape=jax.ShapeDtypeStruct((B, num_o), out_dtype),
        grid_spec=pltpu.PrefetchScalarGridSpec(
            num_scalar_prefetch=0,
            grid=grid,
            in_specs=[
                pl.BlockSpec((bb, num_i), lambda i: (i, 0)),
                inv((num_i, num_h_p)),
                inv((1, num_h_p)),
                inv((num_h_p, num_h_p)),
                inv((1, num_h_p)),
                inv((num_h_p, num_o)),
                inv((1, num_o)),
            ],
            out_specs=pl.BlockSpec((bb, num_o), lambda i: (i, 0)),
        ),
        compiler_params=pltpu.CompilerParams(
            dimension_semantics=("parallel",),
            vmem_limit_bytes=vmem_limit,
        ),
    )(x, w1, b1, w2, b2, w3, b3)
    return out


def init_linear(key, fan_in, fan_out, dtype=jnp.float32):
    # Mimics PyTorch nn.Linear default init: U(-1/sqrt(fan_in), 1/sqrt(fan_in)).
    kw, kb = jax.random.split(key)
    bound = 1.0 / jnp.sqrt(fan_in)
    w = jax.random.uniform(kw, (fan_in, fan_out), dtype, -bound, bound)
    b = jax.random.uniform(kb, (1, fan_out), dtype, -bound, bound)
    return w, b


def mlp_reference(x, w1, b1, w2, b2, w3, b3):
    h = jnp.maximum(x @ w1 + b1, 0.0)
    h = jnp.maximum(h @ w2 + b2, 0.0)
    return h @ w3 + b3


if __name__ == "__main__":
    num_i, num_h, num_o = 32, 64, 16

    key = jax.random.PRNGKey(0)
    kx1, kx2, k1, k2, k3 = jax.random.split(key, 5)

    w1, b1 = init_linear(k1, num_i, num_h)
    w2, b2 = init_linear(k2, num_h, num_h)
    w3, b3 = init_linear(k3, num_h, num_o)

    # One-time parameter prep (padding / optional bf16 cast) outside the
    # per-call path.  f32 matmul path here so the check against the pure-jnp
    # reference is bit-tight; pass use_bf16=True in production for the ~2x
    # MXU rate and halved DMA (biggest relative win on v5e's low HBM BW).
    params = prepare_params(w1, b1, w2, b2, w3, b3, use_bf16=False)

    # Case 1: batch divides the tile exactly (16 rows -> 2 grid steps of 8).
    # Case 2: batch does NOT divide the tile (19 rows -> tiles of 16, partial
    #         tail block clipped by Pallas).
    for kx, batch in ((kx1, 16), (kx2, 19)):
        x = jax.random.normal(kx, (batch, num_i), jnp.float32)
        out = mlp_forward(x, *params, use_bf16=False)
        out = jax.block_until_ready(out)
        ref = mlp_reference(x, w1, b1, w2, b2, w3, b3)
        assert out.shape == (batch, num_o)
        assert jnp.allclose(out, ref, atol=1e-5, rtol=1e-5), (
            f"mismatch at batch={batch}: max abs err "
            f"{jnp.max(jnp.abs(out - ref))}")

    print("KERNEL_OK")
</pallas_src>

<mosaic_0001>
module attributes {stable_mosaic.version = 11 : i64} {
  func.func @mlp_kernel(%arg0: i32, %arg1: memref<8x32xf32, #tpu.memory_space<vmem>>, %arg2: memref<32x128xf32, #tpu.memory_space<vmem>>, %arg3: memref<1x128xf32, #tpu.memory_space<vmem>>, %arg4: memref<128x128xf32, #tpu.memory_space<vmem>>, %arg5: memref<1x128xf32, #tpu.memory_space<vmem>>, %arg6: memref<128x16xf32, #tpu.memory_space<vmem>>, %arg7: memref<1x16xf32, #tpu.memory_space<vmem>>, %arg8: memref<8x16xf32, #tpu.memory_space<vmem>>) attributes {dimension_semantics = [#tpu.dimension_semantics<parallel>], iteration_bounds = array<i64: 2>, scalar_prefetch = 0 : i64, scratch_operands = 0 : i64, tpu.core_type = #tpu.core_type<tc>, window_params = [{transform_indices = @transform_0, window_bounds = array<i64: 8, 32>}, {pipeline_mode = #tpu.pipeline_mode<synchronous>, transform_indices = @transform_1, window_bounds = array<i64: 32, 128>}, {pipeline_mode = #tpu.pipeline_mode<synchronous>, transform_indices = @transform_2, window_bounds = array<i64: 1, 128>}, {pipeline_mode = #tpu.pipeline_mode<synchronous>, transform_indices = @transform_3, window_bounds = array<i64: 128, 128>}, {pipeline_mode = #tpu.pipeline_mode<synchronous>, transform_indices = @transform_4, window_bounds = array<i64: 1, 128>}, {pipeline_mode = #tpu.pipeline_mode<synchronous>, transform_indices = @transform_5, window_bounds = array<i64: 128, 16>}, {pipeline_mode = #tpu.pipeline_mode<synchronous>, transform_indices = @transform_6, window_bounds = array<i64: 1, 16>}, {transform_indices = @transform_7, window_bounds = array<i64: 8, 16>}]} {
    %c0 = arith.constant 0 : index
    %c0_0 = arith.constant 0 : index
    %0 = vector.load %arg1[%c0, %c0_0] : memref<8x32xf32, #tpu.memory_space<vmem>>, vector<8x32xf32>
    %c0_1 = arith.constant 0 : index
    %c0_2 = arith.constant 0 : index
    %1 = vector.load %arg2[%c0_1, %c0_2] : memref<32x128xf32, #tpu.memory_space<vmem>>, vector<32x128xf32>
    %cst = arith.constant dense<0.000000e+00> : vector<8x128xf32>
    %2 = tpu.matmul %0, %1, %cst {dimension_numbers = #tpu.dot_dimension_numbers<[1], [0], [0], [1], [0, 0, 1, 1], [], []>} : vector<8x32xf32>, vector<32x128xf32>, vector<8x128xf32> -> vector<8x128xf32>
    %c0_3 = arith.constant 0 : index
    %c0_4 = arith.constant 0 : index
    %3 = vector.load %arg3[%c0_3, %c0_4] : memref<1x128xf32, #tpu.memory_space<vmem>>, vector<1x128xf32>
    %4 = vector.broadcast %3 : vector<1x128xf32> to vector<8x128xf32>
    %5 = arith.addf %2, %4 : vector<8x128xf32>
    %cst_5 = arith.constant 0.000000e+00 : f32
    %6 = vector.broadcast %cst_5 : f32 to vector<8x128xf32>
    %7 = arith.maximumf %5, %6 : vector<8x128xf32>
    %c0_6 = arith.constant 0 : index
    %c0_7 = arith.constant 0 : index
    %8 = vector.load %arg4[%c0_6, %c0_7] : memref<128x128xf32, #tpu.memory_space<vmem>>, vector<128x128xf32>
    %cst_8 = arith.constant dense<0.000000e+00> : vector<8x128xf32>
    %9 = tpu.matmul %7, %8, %cst_8 {dimension_numbers = #tpu.dot_dimension_numbers<[1], [0], [0], [1], [0, 0, 1, 1], [], []>} : vector<8x128xf32>, vector<128x128xf32>, vector<8x128xf32> -> vector<8x128xf32>
    %c0_9 = arith.constant 0 : index
    %c0_10 = arith.constant 0 : index
    %10 = vector.load %arg5[%c0_9, %c0_10] : memref<1x128xf32, #tpu.memory_space<vmem>>, vector<1x128xf32>
    %11 = vector.broadcast %10 : vector<1x128xf32> to vector<8x128xf32>
    %12 = arith.addf %9, %11 : vector<8x128xf32>
    %cst_11 = arith.constant 0.000000e+00 : f32
    %13 = vector.broadcast %cst_11 : f32 to vector<8x128xf32>
    %14 = arith.maximumf %12, %13 : vector<8x128xf32>
    %c0_12 = arith.constant 0 : index
    %c0_13 = arith.constant 0 : index
    %15 = vector.load %arg6[%c0_12, %c0_13] : memref<128x16xf32, #tpu.memory_space<vmem>>, vector<128x16xf32>
    %cst_14 = arith.constant dense<0.000000e+00> : vector<8x16xf32>
    %16 = tpu.matmul %14, %15, %cst_14 {dimension_numbers = #tpu.dot_dimension_numbers<[1], [0], [0], [1], [0, 0, 1, 1], [], []>} : vector<8x128xf32>, vector<128x16xf32>, vector<8x16xf32> -> vector<8x16xf32>
    %c0_15 = arith.constant 0 : index
    %c0_16 = arith.constant 0 : index
    %17 = vector.load %arg7[%c0_15, %c0_16] : memref<1x16xf32, #tpu.memory_space<vmem>>, vector<1x16xf32>
    %18 = vector.broadcast %17 : vector<1x16xf32> to vector<8x16xf32>
    %19 = arith.addf %16, %18 : vector<8x16xf32>
    %c0_17 = arith.constant 0 : index
    %c0_18 = arith.constant 0 : index
    %20 = vector.load %arg8[%c0_17, %c0_18] : memref<8x16xf32, #tpu.memory_space<vmem>>, vector<8x16xf32>
    tpu.vector_store %arg8[%c0_17, %c0_18], %19 {strides = array<i32>} : memref<8x16xf32, #tpu.memory_space<vmem>>, vector<8x16xf32>,
    return
  }
  func.func @transform_0(%arg0: i32) -> (i32, i32) {
    %c0_i32 = arith.constant 0 : i32
    %c0_i32_0 = arith.constant 0 : i32
    return %arg0, %c0_i32 : i32, i32
  }
  func.func @transform_1(%arg0: i32) -> (i32, i32) {
    %c0_i32 = arith.constant 0 : i32
    %c0_i32_0 = arith.constant 0 : i32
    %c0_i32_1 = arith.constant 0 : i32
    return %c0_i32, %c0_i32_0 : i32, i32
  }
  func.func @transform_2(%arg0: i32) -> (i32, i32) {
    %c0_i32 = arith.constant 0 : i32
    %c0_i32_0 = arith.constant 0 : i32
    %c0_i32_1 = arith.constant 0 : i32
    return %c0_i32, %c0_i32_0 : i32, i32
  }
  func.func @transform_3(%arg0: i32) -> (i32, i32) {
    %c0_i32 = arith.constant 0 : i32
    %c0_i32_0 = arith.constant 0 : i32
    %c0_i32_1 = arith.constant 0 : i32
    return %c0_i32, %c0_i32_0 : i32, i32
  }
  func.func @transform_4(%arg0: i32) -> (i32, i32) {
    %c0_i32 = arith.constant 0 : i32
    %c0_i32_0 = arith.constant 0 : i32
    %c0_i32_1 = arith.constant 0 : i32
    return %c0_i32, %c0_i32_0 : i32, i32
  }
  func.func @transform_5(%arg0: i32) -> (i32, i32) {
    %c0_i32 = arith.constant 0 : i32
    %c0_i32_0 = arith.constant 0 : i32
    %c0_i32_1 = arith.constant 0 : i32
    return %c0_i32, %c0_i32_0 : i32, i32
  }
  func.func @transform_6(%arg0: i32) -> (i32, i32) {
    %c0_i32 = arith.constant 0 : i32
    %c0_i32_0 = arith.constant 0 : i32
    %c0_i32_1 = arith.constant 0 : i32
    return %c0_i32, %c0_i32_0 : i32, i32
  }
  func.func @transform_7(%arg0: i32) -> (i32, i32) {
    %c0_i32 = arith.constant 0 : i32
    %c0_i32_0 = arith.constant 0 : i32
    return %arg0, %c0_i32 : i32, i32
  }
}

</mosaic_0001>

<bundles_post_ra>
// kernel: mlp_forward.1
= control target key start
LH: loop header
LB: loop body
LE: loop exit
PB: predicated region body
PF: predicated region fallthrough
CT: control target
= control target key end

     0   :  { %12 = vsyncpa [#allocation3], 0  ;;  %s904_s0 = inlined_call_operand.vmem [shape: f32[16,32], index: 0, kind: input, shape index: {}]   ;;  %s905_s1 = inlined_call_operand.hbm [shape: f32[32,128], index: 1, kind: input, shape index: {}]   ;;  %s906_s2 = inlined_call_operand.vmem [shape: f32[1,128], index: 2, kind: input, shape index: {}]   ;;  %s907_s3 = inlined_call_operand.vmem [shape: f32[128,128], index: 3, kind: input, shape index: {}]   ;;  %s908_s4 = inlined_call_operand.vmem [shape: f32[1,128], index: 4, kind: input, shape index: {}]   ;;  %s909_s5 = inlined_call_operand.vmem [shape: f32[128,16], index: 5, kind: input, shape index: {}]   ;;  %s910_s6 = inlined_call_operand.vmem [shape: f32[1,16], index: 6, kind: input, shape index: {}]   ;;  %s911_s7 = inlined_call_operand.hbm [shape: f32[16,16], index: 7, kind: output, shape index: {}]  }
   0x1   :  { %13 = vsyncpa [#allocation4], 0 }
   0x2   :  { %15 = vsyncpa [#allocation4 + $0x1], 0  ;;  %s704_s24 = smov 0   ;;  %s706_s25 = smov 0  }
   0x3   :  { %s708_s26 = smov 0   ;;  %s710_s27 = smov 0  }
   0x4 LB: > { %s725_s28 = sadd.s32 4294967295, %s659_s27   ;;  %s495_s29 = sadd.s32 4294967294, %s659_s27   ;;  %s659_s27 = sphi %s710_s27, %s917_s27   ;;  %s655_s26 = sphi %s708_s26, %s916_s26   ;;  %s651_s25 = sphi %s706_s25, %s915_s25   ;;  %s647_s24 = sphi %s704_s24, %s914_s24  }
   0x5   : > { %s729_s30 = sadd.s32 1, %s659_s27   ;;  %s180_s8 = sadd.s32 1, %s655_s26 }
   0x6   : > { %s177_s9 = ssub.s32 %s659_s27, %s729_s30  ;;  %p190_p0 = scmp.ne.s32.totalorder %s655_s26, %s651_s25 }
   0x7   : > { %p178_p1 = scmp.eq.s32.totalorder %s177_s9, 0  ;;  %p191_p2 = scmp.eq.s32.totalorder %s725_s28, 1 }
   0x8   : > { %p196_p3 = scmp.ne.s32.totalorder %s651_s25, %s647_s24  ;;  %p197_p4 = scmp.eq.s32.totalorder %s495_s29, 1 }
   0x9   : > { %s740_s10 = scalar_select %p178_p1, %s655_s26, %s180_s8  }
   0xa   : > { %p742_p5 = por %p191_p2, %p190_p0  ;;  %p746_p6 = por %p197_p4, %p196_p3 }
   0xb   : > { %p496_p7 = scmp.ge.s32.totalorder %s659_s27, 1  ;;  %p204_p8 = scmp.lt.s32.totalorder %s659_s27, 3 }
   0xc   : > { %p522_p9 = scmp.eq.s32.totalorder %s725_s28, 0  ;;  %s215_s15 = sshll.u32 %s905_s1, 4  ;;  %s216_s15 = int_to_ptr.hbm [resolvable:$true] %s215_s15 }
   0xd   : > { %p205_p10 = pnand %p496_p7, %p204_p8  ;;  %s661_s16 = smov [#allocation2]  }
   0xe   : > { %s217_s17 = sshll.u32 %s661_s16, 4  ;;  %s662_s18 = smov 128   ;;  %s218_s17 = int_to_ptr.vmem [resolvable:$true] %s217_s17 }
   0xf   : > { %p514_p11 = pneg %p205_p10  ;;  %s663_s19 = smov 8  }
  0x10   : > { %255 = sbr.rel (%p205_p10) target bundleno = 427 (0x1ab), region = 48 }
  0x11   : > { %p515_p12 = pnand %p522_p9, %p514_p11 }
  0x13   : > { %517 = dma.hbm_to_vmem [thread:$0]  (!%p515_p12), %s216_s15, 512, %s218_s17, [#allocation3], %s662_s18, %s662_s18, %s663_s19  }
  0x15   : > { %638 = dma.done.wait (%p522_p9), [#allocation3], 512  }
  0x16   : > { %640 = vsyncadd (%p522_p9), [#allocation3], 4294966784  ;;  %p287_p13 = scmp.lt.s32.totalorder %s725_s28, 1  ;;  %v295_v0 = vld [vmem:[#allocation2 + $0x18] sm:$0xff]  ;;  %v294_v1 = vld [vmem:[#allocation2 + $0x10] sm:$0xff]  ;;  %vm300_vm0 = vcmask 261120  }
  0x17   : > { %316 = vmatpush.msra.mxu0 %v295_v0  ;;  %v340_v2 = vld [vmem:[%s907_s3 + $0x78] sm:$0xff]  ;;  %v293_v3 = vld [vmem:[#allocation2 + $0x8] sm:$0xff]  ;;  %v339_v4 = vld [vmem:[%s907_s3 + $0x70] sm:$0xff]  ;;  %s284_s23 = sand.u32 1, %s651_s25   ;;  %s505_s8 = sshll.u32 %s725_s28, 3  ;;  %vm406_vm1 = vcmask 130048  }
  0x18   : > { %s288_s20 = scalar_select %p287_p13, %s725_s28, 1  ;;  %345 = vmatpush.msra.mxu1 %v340_v2  ;;  %v338_v5 = vld [vmem:[%s907_s3 + $0x68] sm:$0xff]  ;;  %v292_v6 = vld [vmem:[#allocation2] sm:$0xff]  ;;  %v336_v9 = vld [vmem:[%s907_s3 + $0x58] sm:$0xff] }
  0x19   : > { %317 = vmatpush.msra.mxu0 %v294_v1  ;;  %v337_v8 = vld [vmem:[%s907_s3 + $0x60] sm:$0xff]  ;;  %v335_v10 = vld [vmem:[%s907_s3 + $0x50] sm:$0xff]  ;;  %v334_v11 = vld [vmem:[%s907_s3 + $0x48] sm:$0xff]  ;;  %s501_s29 = sshll.u32 %s284_s23, 3  ;;  %s419_s14 = scalar_lea.hbm %s911_s7, %s505_s8 }
  0x1a   : > { %s502_s21 = sshll.u32 %s288_s20, 3  ;;  %346 = vmatpush.msra.mxu1 %v339_v4  ;;  %v333_v12 = vld [vmem:[%s907_s3 + $0x40] sm:$0xff]  ;;  %v332_v13 = vld [vmem:[%s907_s3 + $0x38] sm:$0xff]  ;;  %v331_v14 = vld [vmem:[%s907_s3 + $0x30] sm:$0xff]  ;;  %s286_s17 = scalar_lea.vmem [#allocation5], %s501_s29 }
  0x1b   : > { %s290_s9 = scalar_lea.vmem %s904_s0, %s502_s21  ;;  %318 = vmatpush.msra.mxu0 %v293_v3  ;;  %v330_v15 = vld [vmem:[%s907_s3 + $0x28] sm:$0xff]  ;;  %v329_v16 = vld [vmem:[%s907_s3 + $0x20] sm:$0xff]  ;;  %v328_v17 = vld [vmem:[%s907_s3 + $0x18] sm:$0xff]  ;;  %s421_s18 = sshll.u32 %s286_s17, 4  ;;  %s422_s18 = int_to_ptr.vmem [resolvable:$true] %s421_s18 }
  0x1c   : > { %v291_v7 = vld [vmem:[%s290_s9] sm:$0xff]  ;;  %347 = vmatpush.msra.mxu1 %v338_v5  ;;  %v327_v18 = vld [vmem:[%s907_s3 + $0x10] sm:$0xff]  ;;  %v326_v19 = vld [vmem:[%s907_s3 + $0x8] sm:$0xff]  ;;  %s423_s19 = sshll.u32 %s419_s14, 4  ;;  %s409_s20 = scalar_lea.sflag [#allocation4], %s284_s23  ;;  %s424_s19 = int_to_ptr.hbm [resolvable:$true] %s423_s19 }
  0x1d   : > { %319 = vmatpush.msra.mxu0 %v292_v6  ;;  %v325_v20 = vld [vmem:[%s907_s3] sm:$0xff]  ;;  %v381_v21 = vld [vmem:[%s909_s5 + $0x78] sm:$0xff]  ;;  %v380_v22 = vld [vmem:[%s909_s5 + $0x70] sm:$0xff]  ;;  %s607_s28 = sshra.s32 %s424_s19, 4  ;;  %s613_s29 = scalar_lea.hbm %s911_s7, 16  ;;  %s608_s28 = int_to_ptr.hbm [resolvable:$true] %s607_s28 }
  0x1e   : > { %503 = vmatmul.msk.f32.vlgmr.msra.gmra.mxu0 %vm300_vm0, %v291_v7  ;;  %348 = vmatpush.msra.mxu1 %v337_v8  ;;  %v379_v23 = vld [vmem:[%s909_s5 + $0x68] sm:$0xff]  ;;  %v378_v24 = vld [vmem:[%s909_s5 + $0x60] sm:$0xff]  ;;  %v377_v25 = vld [vmem:[%s909_s5 + $0x58] sm:$0xff]  ;;  %s609_s21 = scalar_lea.hbm %s608_s28, 8  ;;  %p614_p3 = scmp.lt.s32.totalorder %s608_s28, %s911_s7 }
  0x1f   : > { %386 = vmatpush.msra.mxu2 %v381_v21  ;;  %v376_v26 = vld [vmem:[%s909_s5 + $0x50] sm:$0xff]  ;;  %v375_v27 = vld [vmem:[%s909_s5 + $0x48] sm:$0xff]  ;;  %v374_v28 = vld [vmem:[%s909_s5 + $0x40] sm:$0xff]  ;;  %p610_p0 = scmp.ne.s32.totalorder %s608_s28, %s609_s21  ;;  %p615_p4 = scmp.lt.s32.totalorder %s613_s29, %s609_s21 }
  0x20   : > { %349 = vmatpush.msra.mxu1 %v336_v9  ;;  %v373_v29 = vld [vmem:[%s909_s5 + $0x38] sm:$0xff]  ;;  %v372_v30 = vld [vmem:[%s909_s5 + $0x30] sm:$0xff]  ;;  %v371_v31 = vld [vmem:[%s909_s5 + $0x28] sm:$0xff] }
  0x21   : > { %387 = vmatpush.msra.mxu2 %v380_v22  ;;  %v370_v32 = vld [vmem:[%s909_s5 + $0x20] sm:$0xff]  ;;  %v369_v33 = vld [vmem:[%s909_s5 + $0x18] sm:$0xff]  ;;  %v368_v38 = vld [vmem:[%s909_s5 + $0x10] sm:$0xff]  ;;  %p611_p1 = pnand %p610_p0, %p742_p5  ;;  %p616_p7 = por %p615_p4, %p614_p3 }
  0x22   : > { %350 = vmatpush.msra.mxu1 %v335_v10  ;;  %v560_v34 = vld [vmem:[%s906_s2] ss:$0 sm:$0xff]  ;;  %v367_v39 = vld [vmem:[%s909_s5 + $0x8] sm:$0xff] }
  0x23   : > { %388 = vmatpush.msra.mxu2 %v379_v23  ;;  %v366_v40 = vld [vmem:[%s909_s5] sm:$0xff]  ;;  %p612_p2 = pneg %p611_p1 }
  0x24   : > { %351 = vmatpush.msra.mxu1 %v334_v11  ;;  %v561_v41 = vld [vmem:[%s908_s4] ss:$0 sm:$0xff] }
  0x25   : > { %389 = vmatpush.msra.mxu2 %v378_v24  ;;  %v562_v45 = vld [vmem:[%s910_s6] ss:$0 sm:$0xff]  ;;  %p617_p8 = pnand %p616_p7, %p612_p2 }
  0x26   : > { %352 = vmatpush.msra.mxu1 %v333_v12 }
  0x27   : > { %390 = vmatpush.msra.mxu2 %v377_v25 }
  0x28   : > { %353 = vmatpush.msra.mxu1 %v332_v13 }
  0x29   : > { %391 = vmatpush.msra.mxu2 %v376_v26 }
  0x2a   : > { %354 = vmatpush.msra.mxu1 %v331_v14 }
  0x2b   : > { %392 = vmatpush.msra.mxu2 %v375_v27 }
  0x2c   : > { %355 = vmatpush.msra.mxu1 %v330_v15 }
  0x2d   : > { %393 = vmatpush.msra.mxu2 %v374_v28 }
  0x2e   : > { %356 = vmatpush.msra.mxu1 %v329_v16 }
  0x2f   : > { %394 = vmatpush.msra.mxu2 %v373_v29 }
  0x30   : > { %357 = vmatpush.msra.mxu1 %v328_v17 }
  0x31   : > { %395 = vmatpush.msra.mxu2 %v372_v30 }
  0x32   : > { %358 = vmatpush.msra.mxu1 %v327_v18 }
  0x33   : > { %396 = vmatpush.msra.mxu2 %v371_v31 }
  0x34   : > { %359 = vmatpush.msra.mxu1 %v326_v19 }
  0x35   : > { %397 = vmatpush.msra.mxu2 %v370_v32 }
  0x36   : > { %360 = vmatpush.msra.mxu1 %v325_v20 }
  0x37   : > { %398 = vmatpush.msra.mxu2 %v369_v33 }
  0x39   : > { %399 = vmatpush.msra.mxu2 %v368_v38 }
  0x3b   : > { %400 = vmatpush.msra.mxu2 %v367_v39 }
  0x3d   : > { %401 = vmatpush.msra.mxu2 %v366_v40 }
  0x9b   : > { %v321_v35 = vpop.f32.mrf.mxu0 }
  0x9c   : > { %v322_v36 = vadd.f32 %v560_v34, %v321_v35 }
  0x9e   : > { %v324_v37 = vmax.f32 %v322_v36, 0.0 }
  0xa0   : > { %361 = vmatmul.f32.vlgmr.msra.gmra.mxu1 %v324_v37 }
 0x11d   : > { %v362_v42 = vpop.f32.mrf.mxu1 }
 0x11e   : > { %v363_v43 = vadd.f32 %v561_v41, %v362_v42 }
 0x120   : > { %v365_v44 = vmax.f32 %v363_v43, 0.0 }
 0x122   : > { %402 = vmatmul.f32.vlgmr.msra.gmra.mxu2 %v365_v44 }
 0x1a5   : > { %v403_v46 = vpop.f32.mrf.mxu2 }
 0x1a6   : > { %v404_v47 = vadd.f32 %v562_v45, %v403_v46 }
 0x1a8   : > { %407 = vst.msk [vmem:[%s286_s17] sm:$0xff] %vm406_vm1, %v404_v47 }
 0x1a9   : > { %620 = shalt.err (!%p617_p8)
}
 0x1aa   : > { %512 = dma.vmem_to_hbm [thread:$0]  (%p742_p5), %s422_s18, 128, %s424_s19, %s409_s20  }
 0x1ab PF: > { %p524_p9 = scmp.ge.s32.totalorder %s659_s27, 2  ;;  %s435_s23 = sand.u32 1, %s647_s24  }
 0x1ac   : > { %s436_s14 = scalar_lea.sflag [#allocation4], %s435_s23 }
 0x1ad   : > { %p519_p10 = pnand %p524_p9, %p746_p6 }
 0x1af   : > { %p520_p11 = pneg %p519_p10 }
 0x1b1   : > { %642 = dma.done.wait (%p520_p11), %s436_s14, 128  }
 0x1b2   : > { %644 = vsyncadd (%p520_p11), %s436_s14, 4294967168  ;;  %p18_p12 = scmp.ge.s32.totalorder %s729_s30, 4   ;;  %s914_s24 = smov %s651_s25 }
 0x1b3   : > { %s915_s25 = smov %s655_s26  ;;  %s916_s26 = smov %s740_s10 }
 0x1b4   : > { %s917_s27 = smov %s729_s30  ;;  %20 = sbr.rel (!%p18_p12) target bundleno = 4 (0x4), region = 88 }
 0x1b9   :  { %442 = vsyncpa [#allocation3], 1 }
 0x1ba   :  { %444 = vsyncpa [#allocation3 + $0x1], 1 }
 0x1bb   :  { %445 = vsyncpa [#allocation4], 1 }
 0x1bc   :  { %447 = vsyncpa [#allocation4 + $0x1], 1 }

</bundles_post_ra>
